<compile_context>
chip_gen: v7x
topology: tpu7x:2x2x1
jax: 0.10.0
libtpu: 0.0.40
codegen_flags: <defaults>
</compile_context>

<pallas_src>
import functools

import jax
import jax.numpy as jnp
from jax.experimental import pallas as pl
from jax.experimental.pallas import tpu as pltpu

ALPHA = 1.0
GAMMA = 2.0           # NOTE: hard-coded as (1 - pt) * (1 - pt) in the kernel
WEIGHT = 0.2
NUM_CLASSES = 36


def _round_up(a, b):
    return ((a + b - 1) // b) * b


def _pick_max_block_n():
    """Bigger tiles on v5*/v6* (128 MiB VMEM); conservative 8192 elsewhere."""
    try:
        kind = jax.devices()[0].device_kind.lower()
    except Exception:
        return 8192
    if "v5" in kind or "v6" in kind:
        return 16384
    return 8192


def _focal_loss_kernel(x_ref, t_ref, out_ref, *, n_valid, block_n):
    """One tile: x_ref [TN, C] native-layout logits, t_ref [1, TN] int labels.

    Emits a lane-dense (8, 128) block of partial sums:
      row 0 -> sum over valid examples of (logsumexp - target_logit)   (CE)
      row 1 -> sum over valid examples x classes of the focal term     (FL)
    """
    i = pl.program_id(0)

    # In-kernel XLU transpose to the lane-dense [C, TN] layout (replaces the
    # serial, memory-bound wrapper transpose).
    x = x_ref[...].astype(jnp.float32).T          # [C, TN]
    labels = t_ref[...]                           # [1, TN] int32
    c, tn = x.shape

    # Valid-column mask: the last tile may be a partial (OOB-padded) block.
    col = jax.lax.broadcasted_iota(jnp.int32, (1, tn), 1) + i * block_n
    valid = col < n_valid                         # [1, TN] bool
    valid_f = valid.astype(jnp.float32)

    # Clamp OOB garbage BEFORE any exp/log (NaN * 0 == NaN would otherwise
    # poison the partial sums).  Labels only feed an equality compare (no
    # gather), so they need no clamping.
    x = jnp.where(valid, x, 0.0)                  # broadcast over classes

    # Target mask rebuilt in-kernel from iota (no one-hot ever DMA'd).
    cls = jax.lax.broadcasted_iota(jnp.int32, (c, tn), 0)
    mask = cls == labels                          # [C, TN] bool
    mask_f = mask.astype(jnp.float32)

    # ---- cross entropy: per-example logsumexp - target logit --------------
    m = jnp.max(x, axis=0, keepdims=True)                            # [1, TN]
    lse = m + jnp.log(jnp.sum(jnp.exp(x - m), axis=0, keepdims=True))
    tgt = jnp.sum(x * mask_f, axis=0, keepdims=True)                 # [1, TN]
    ce_part = jnp.sum((lse - tgt) * valid_f)                         # scalar

    # ---- BCE-with-logits + focal modulation --------------------------------
    e = jnp.exp(-jnp.abs(x))                                         # exp(-|x|)
    # max(x,0) - x*y + log1p(e)  ==  relu(y ? -x : x) + log1p(e)
    bce = jax.nn.relu(jnp.where(mask, -x, x)) + jnp.log1p(e)
    # pt = exp(-bce) == sigmoid(x) if target else 1 - sigmoid(x); via the
    # sigmoid identity with approx reciprocal + one Newton-Raphson step.
    d = 1.0 + e
    inv = pl.reciprocal(d, approx=True)
    inv = inv * (2.0 - d * inv)                                      # NR step
    pt = jnp.where(jnp.logical_xor(mask, x >= 0.0), e * inv, inv)
    one_m_pt = 1.0 - pt
    fl = ALPHA * one_m_pt * one_m_pt * bce                           # gamma=2
    # Reduce over classes first so the valid multiply is [1, TN], not [C, TN].
    fl_part = jnp.sum(jnp.sum(fl, axis=0, keepdims=True) * valid_f)  # scalar

    # ---- lane-dense partial-sum output block -------------------------------
    row = jax.lax.broadcasted_iota(jnp.int32, (8, 128), 0)
    out_ref[...] = jnp.where(
        row == 0, ce_part, jnp.where(row == 1, fl_part, 0.0)
    ).astype(jnp.float32)


def focal_loss(inputs, targets, *, max_block_n=None):
    """inputs: [N, NUM_CLASSES] float logits; targets: [N] integer labels."""
    n, c = inputs.shape
    assert c == NUM_CLASSES
    if max_block_n is None:
        max_block_n = _pick_max_block_n()

    # Batch axis maps to the 128-lane axis after the in-kernel transpose, so
    # blocks are multiples of 128 examples.  Aim for >= 2 tiles so the
    # "parallel" grid axis shards across both v7x TensorCores.
    block_n = min(max_block_n, max(128, _round_up((n + 1) // 2, 128)))
    num_tiles = -(-n // block_n)

    # Labels ride along as a tiny [1, N] int32 input (no pad, no one-hot).
    t2d = targets.astype(jnp.int32).reshape(1, n)

    kernel = functools.partial(_focal_loss_kernel, n_valid=n, block_n=block_n)
    vmem_limit = (64 if block_n > 8192 else 32) * 1024 * 1024

    partials = pl.pallas_call(
        kernel,
        out_shape=jax.ShapeDtypeStruct((num_tiles * 8, 128), jnp.float32),
        grid=(num_tiles,),
        in_specs=[
            pl.BlockSpec((block_n, NUM_CLASSES), lambda i: (i, 0)),
            pl.BlockSpec((1, block_n), lambda i: (0, i)),
        ],
        out_specs=pl.BlockSpec((8, 128), lambda i: (i, 0)),
        compiler_params=pltpu.CompilerParams(
            dimension_semantics=("parallel",),
            vmem_limit_bytes=vmem_limit,
        ),
        cost_estimate=pl.CostEstimate(
            flops=20 * n * c,
            transcendentals=3 * n * c,
            bytes_accessed=n * c * inputs.dtype.itemsize
            + n * 4
            + num_tiles * 8 * 128 * 4,
        ),
    )(inputs, t2d)

    # Tiny final combine (num_tiles scalars each) stays in the wrapper so the
    # grid axis remains "parallel".
    p = partials.reshape(num_tiles, 8, 128)
    ce = jnp.sum(p[:, 0, 0]) / n
    fl_mean = jnp.sum(p[:, 1, 0]) / (n * NUM_CLASSES)
    return WEIGHT * fl_mean + ce


def focal_loss_ref(inputs, targets):
    """Pure-JAX reference (mirrors the PyTorch module)."""
    x = inputs.astype(jnp.float32)
    y = jax.nn.one_hot(targets, NUM_CLASSES, dtype=jnp.float32)
    ce = jnp.mean(jax.nn.logsumexp(x, axis=-1) - jnp.sum(x * y, axis=-1))
    bce = jnp.maximum(x, 0.0) - x * y + jnp.log1p(jnp.exp(-jnp.abs(x)))
    pt = jnp.exp(-bce)
    fl = ALPHA * (1.0 - pt) ** 2 * bce
    return WEIGHT * jnp.mean(fl) + ce


if __name__ == "__main__":
    key = jax.random.PRNGKey(0)
    k_x, k_t, k_x2, k_t2 = jax.random.split(key, 4)

    # Small case (single ragged tile: batch 8 lives in a 128-wide partial
    # block that is masked in-kernel — no wrapper pad).
    batch = 8
    inputs = jax.random.normal(k_x, (batch, NUM_CLASSES), dtype=jnp.float32)
    targets = jax.random.randint(k_t, (batch,), 0, NUM_CLASSES, dtype=jnp.int32)

    out = focal_loss(inputs, targets)
    jax.block_until_ready(out)
    ref = focal_loss_ref(inputs, targets)
    assert jnp.allclose(out, ref, rtol=1e-5, atol=1e-5), (out, ref)

    # Multi-tile case with a ragged last tile (exercises grid + valid mask).
    batch2 = 300
    inputs2 = jax.random.normal(k_x2, (batch2, NUM_CLASSES), dtype=jnp.float32)
    targets2 = jax.random.randint(k_t2, (batch2,), 0, NUM_CLASSES,
                                  dtype=jnp.int32)
    out2 = focal_loss(inputs2, targets2, max_block_n=128)
    jax.block_until_ready(out2)
    ref2 = focal_loss_ref(inputs2, targets2)
    assert jnp.allclose(out2, ref2, rtol=1e-5, atol=1e-5), (out2, ref2)

    print("KERNEL_OK")
</pallas_src>

<mosaic_0001>
module attributes {stable_mosaic.version = 11 : i64} {
  func.func @_focal_loss_kernel(%arg0: i32, %arg1: memref<128x36xf32, #tpu.memory_space<vmem>>, %arg2: memref<1x128xi32, #tpu.memory_space<vmem>>, %arg3: memref<8x128xf32, #tpu.memory_space<vmem>>) attributes {dimension_semantics = [#tpu.dimension_semantics<parallel>], iteration_bounds = array<i64: 1>, scalar_prefetch = 0 : i64, scratch_operands = 0 : i64, tpu.core_type = #tpu.core_type<tc>, window_params = [{transform_indices = @transform_0, window_bounds = array<i64: 128, 36>}, {transform_indices = @transform_1, window_bounds = array<i64: 1, 128>}, {transform_indices = @transform_2, window_bounds = array<i64: 8, 128>}]} {
    %c0 = arith.constant 0 : index
    %c0_0 = arith.constant 0 : index
    %0 = vector.load %arg1[%c0, %c0_0] : memref<128x36xf32, #tpu.memory_space<vmem>>, vector<128x36xf32>
    %1 = tpu.transpose %0, [1, 0] : vector<128x36xf32> -> vector<36x128xf32>
    %c0_1 = arith.constant 0 : index
    %c0_2 = arith.constant 0 : index
    %2 = vector.load %arg2[%c0_1, %c0_2] : memref<1x128xi32, #tpu.memory_space<vmem>>, vector<1x128xi32>
    %3 = tpu.iota {dimensions = array<i32: 1>} : vector<1x128xi32>
    %c128_i32 = arith.constant 128 : i32
    %4 = arith.muli %arg0, %c128_i32 : i32
    %5 = vector.broadcast %4 : i32 to vector<1x128xi32>
    %6 = arith.addi %3, %5 : vector<1x128xi32>
    %c8_i32 = arith.constant 8 : i32
    %7 = vector.broadcast %c8_i32 : i32 to vector<1x128xi32>
    %8 = arith.cmpi slt, %6, %7 : vector<1x128xi32>
    %9 = arith.extui %8 : vector<1x128xi1> to vector<1x128xi32>
    %10 = arith.sitofp %9 : vector<1x128xi32> to vector<1x128xf32>
    %cst = arith.constant 0.000000e+00 : f32
    %11 = vector.shape_cast %8 : vector<1x128xi1> to vector<1x128xi1>
    %12 = vector.broadcast %11 : vector<1x128xi1> to vector<36x128xi1>
    %13 = vector.broadcast %cst : f32 to vector<36x128xf32>
    %14 = arith.select %12, %1, %13 : vector<36x128xi1>, vector<36x128xf32>
    %15 = tpu.iota {dimensions = array<i32: 0>} : vector<36x128xi32>
    %16 = vector.broadcast %2 : vector<1x128xi32> to vector<36x128xi32>
    %17 = arith.cmpi eq, %15, %16 : vector<36x128xi32>
    %18 = arith.extui %17 : vector<36x128xi1> to vector<36x128xi32>
    %19 = arith.sitofp %18 : vector<36x128xi32> to vector<36x128xf32>
    %cst_3 = arith.constant dense<0xFF800000> : vector<128xf32>
    %20 = vector.multi_reduction <maximumf>, %14, %cst_3 [0] : vector<36x128xf32> to vector<128xf32>
    %21 = vector.shape_cast %20 : vector<128xf32> to vector<1x128xf32>
    %22 = vector.broadcast %21 : vector<1x128xf32> to vector<36x128xf32>
    %23 = arith.subf %14, %22 : vector<36x128xf32>
    %24 = math.exp %23 : vector<36x128xf32>
    %cst_4 = arith.constant dense<0.000000e+00> : vector<128xf32>
    %25 = vector.multi_reduction <add>, %24, %cst_4 [0] : vector<36x128xf32> to vector<128xf32>
    %26 = vector.shape_cast %25 : vector<128xf32> to vector<1x128xf32>
    %27 = math.log %26 : vector<1x128xf32>
    %28 = arith.addf %21, %27 : vector<1x128xf32>
    %29 = arith.mulf %14, %19 : vector<36x128xf32>
    %cst_5 = arith.constant dense<0.000000e+00> : vector<128xf32>
    %30 = vector.multi_reduction <add>, %29, %cst_5 [0] : vector<36x128xf32> to vector<128xf32>
    %31 = vector.shape_cast %30 : vector<128xf32> to vector<1x128xf32>
    %32 = arith.subf %28, %31 : vector<1x128xf32>
    %33 = arith.mulf %32, %10 : vector<1x128xf32>
    %34 = vector.shape_cast %33 : vector<1x128xf32> to vector<1x1x128xf32>
    %cst_6 = arith.constant dense<0.000000e+00> : vector<1xf32>
    %35 = vector.multi_reduction <add>, %34, %cst_6 [1, 2] : vector<1x1x128xf32> to vector<1xf32>
    %36 = vector.shape_cast %35 : vector<1xf32> to vector<1x1x1xf32>
    %37 = vector.extract %36[0, 0, 0] : f32 from vector<1x1x1xf32>
    %38 = math.absf %14 : vector<36x128xf32>
    %cst_7 = arith.constant 0.000000e+00 : f32
    %39 = vector.broadcast %cst_7 : f32 to vector<36x128xf32>
    %40 = arith.subf %39, %38 : vector<36x128xf32>
    %41 = math.exp %40 : vector<36x128xf32>
    %cst_8 = arith.constant 0.000000e+00 : f32
    %42 = vector.broadcast %cst_8 : f32 to vector<36x128xf32>
    %43 = arith.subf %42, %14 : vector<36x128xf32>
    %44 = arith.select %17, %43, %14 : vector<36x128xi1>, vector<36x128xf32>
    %cst_9 = arith.constant 0.000000e+00 : f32
    %45 = vector.broadcast %cst_9 : f32 to vector<36x128xf32>
    %46 = arith.maximumf %44, %45 : vector<36x128xf32>
    %47 = math.log1p %41 : vector<36x128xf32>
    %48 = arith.addf %46, %47 : vector<36x128xf32>
    %cst_10 = arith.constant 1.000000e+00 : f32
    %49 = vector.broadcast %cst_10 : f32 to vector<36x128xf32>
    %50 = arith.addf %49, %41 : vector<36x128xf32>
    %51 = tpu.reciprocal %50 {approx = true} : vector<36x128xf32> -> vector<36x128xf32>
    %52 = arith.mulf %50, %51 : vector<36x128xf32>
    %cst_11 = arith.constant 2.000000e+00 : f32
    %53 = vector.broadcast %cst_11 : f32 to vector<36x128xf32>
    %54 = arith.subf %53, %52 : vector<36x128xf32>
    %55 = arith.mulf %51, %54 : vector<36x128xf32>
    %cst_12 = arith.constant 0.000000e+00 : f32
    %56 = vector.broadcast %cst_12 : f32 to vector<36x128xf32>
    %57 = arith.cmpf oge, %14, %56 : vector<36x128xf32>
    %58 = arith.xori %17, %57 : vector<36x128xi1>
    %59 = arith.mulf %41, %55 : vector<36x128xf32>
    %60 = arith.select %58, %59, %55 : vector<36x128xi1>, vector<36x128xf32>
    %cst_13 = arith.constant 1.000000e+00 : f32
    %61 = vector.broadcast %cst_13 : f32 to vector<36x128xf32>
    %62 = arith.subf %61, %60 : vector<36x128xf32>
    %cst_14 = arith.constant 1.000000e+00 : f32
    %63 = vector.broadcast %cst_14 : f32 to vector<36x128xf32>
    %64 = arith.mulf %63, %62 : vector<36x128xf32>
    %65 = arith.mulf %64, %62 : vector<36x128xf32>
    %66 = arith.mulf %65, %48 : vector<36x128xf32>
    %cst_15 = arith.constant dense<0.000000e+00> : vector<128xf32>
    %67 = vector.multi_reduction <add>, %66, %cst_15 [0] : vector<36x128xf32> to vector<128xf32>
    %68 = vector.shape_cast %67 : vector<128xf32> to vector<1x128xf32>
    %69 = arith.mulf %68, %10 : vector<1x128xf32>
    %70 = vector.shape_cast %69 : vector<1x128xf32> to vector<1x1x128xf32>
    %cst_16 = arith.constant dense<0.000000e+00> : vector<1xf32>
    %71 = vector.multi_reduction <add>, %70, %cst_16 [1, 2] : vector<1x1x128xf32> to vector<1xf32>
    %72 = vector.shape_cast %71 : vector<1xf32> to vector<1x1x1xf32>
    %73 = vector.extract %72[0, 0, 0] : f32 from vector<1x1x1xf32>
    %74 = tpu.iota {dimensions = array<i32: 0>} : vector<8x128xi32>
    %c0_i32 = arith.constant 0 : i32
    %75 = vector.broadcast %c0_i32 : i32 to vector<8x128xi32>
    %76 = arith.cmpi eq, %74, %75 : vector<8x128xi32>
    %c1_i32 = arith.constant 1 : i32
    %77 = vector.broadcast %c1_i32 : i32 to vector<8x128xi32>
    %78 = arith.cmpi eq, %74, %77 : vector<8x128xi32>
    %cst_17 = arith.constant 0.000000e+00 : f32
    %79 = vector.broadcast %73 : f32 to vector<8x128xf32>
    %80 = vector.broadcast %cst_17 : f32 to vector<8x128xf32>
    %81 = arith.select %78, %79, %80 : vector<8x128xi1>, vector<8x128xf32>
    %82 = vector.broadcast %37 : f32 to vector<8x128xf32>
    %83 = arith.select %76, %82, %81 : vector<8x128xi1>, vector<8x128xf32>
    %c0_18 = arith.constant 0 : index
    %c0_19 = arith.constant 0 : index
    %84 = vector.load %arg3[%c0_18, %c0_19] : memref<8x128xf32, #tpu.memory_space<vmem>>, vector<8x128xf32>
    tpu.vector_store %arg3[%c0_18, %c0_19], %83 {strides = array<i32>} : memref<8x128xf32, #tpu.memory_space<vmem>>, vector<8x128xf32>,
    return
  }
  func.func @transform_0(%arg0: i32) -> (i32, i32) {
    %c0_i32 = arith.constant 0 : i32
    %c0_i32_0 = arith.constant 0 : i32
    return %arg0, %c0_i32 : i32, i32
  }
  func.func @transform_1(%arg0: i32) -> (i32, i32) {
    %c0_i32 = arith.constant 0 : i32
    %c0_i32_0 = arith.constant 0 : i32
    return %c0_i32, %arg0 : i32, i32
  }
  func.func @transform_2(%arg0: i32) -> (i32, i32) {
    %c0_i32 = arith.constant 0 : i32
    %c0_i32_0 = arith.constant 0 : i32
    return %arg0, %c0_i32 : i32, i32
  }
}

</mosaic_0001>

<bundles_post_ra>
// kernel: tpu_custom_call.1
= control target key start
LH: loop header
LB: loop body
LE: loop exit
PB: predicated region body
PF: predicated region fallthrough
CT: control target
= control target key end

     0   :  { %7 = vsyncpa [#allocation3], 0  ;;  %s827_s0 = inlined_call_operand.hbm [shape: f32[8,36], index: 0, kind: input, shape index: {}]   ;;  %s828_s1 = inlined_call_operand.vmem [shape: s32[1,8], index: 1, kind: input, shape index: {}]   ;;  %s829_s2 = inlined_call_operand.hbm [shape: f32[8,128], index: 2, kind: output, shape index: {}]  }
   0x1   :  { %8 = vsyncpa [#allocation4], 0 }
   0x2   :  { %13 = vsyncadd [#allocation3], 1920  ;;  %s479_s9 = smov [#allocation2]   ;;  %s431_s13 = scalar_lea.hbm %s827_s0, 128 }
   0x3   :  { %s14_s10 = sshll.u32 %s479_s9, 4  ;;  %p432_p0 = scmp.ne.s32.totalorder %s827_s0, %s431_s13  ;;  %s15_s10 = int_to_ptr.vmem [resolvable:$true] %s14_s10 }
   0x4   :  { %p435_p1 = scmp.lt.u32.totalorder %s431_s13, %s827_s0 }
   0x6   :  { %p437_p2 = pnand %p435_p1, %p432_p0 }
   0x8   :  { %440 = shalt.err (!%p437_p2)
}
   0x9   :  { %s441_s18 = scalar_lea.vmem %s15_s10, 128  ;;  %s445_s19 = scalar_lea.vmem %s15_s10, 2048 }
   0xa   :  { %p442_p3 = scmp.ne.s32.totalorder %s15_s10, %s441_s18  ;;  %p446_p4 = scmp.lt.s32.totalorder %s15_s10, %s15_s10 }
   0xb   :  { %p447_p5 = scmp.lt.s32.totalorder %s445_s19, %s441_s18 }
   0xd   :  { %p448_p6 = por %p447_p5, %p446_p4 }
   0xf   :  { %p449_p7 = pnand %p448_p6, %p442_p3 }
  0x11   :  { %452 = shalt.err (!%p449_p7)
}
  0x12   :  { %s480_s20 = smov 128   ;;  %s481_s21 = smov 8  }
  0x13   :  { %20 = dma.hbm_to_vmem [thread:$0]  %s827_s0, 128, %s15_s10, [#allocation3], %s480_s20, %s480_s20, %s481_s21  }
  0x14   :  { %475 = dma.done.wait [#allocation3], 2048  }
  0x15   :  { %476 = vsyncadd [#allocation3], 4294965248  ;;  %v26_v0 = vld [vmem:[#allocation2] sm:$0xff]  ;;  %v27_v1 = vld [vmem:[#allocation2 + $0x8] sm:$0xff]  ;;  %v75_v16 = vlaneseq  ;;  %vm114_vm1 = vcmask 1043456   ;;  %s483_s25 = smov [#allocation5]  }
  0x16   :  { %42 = vxpose.xlu0.b32.start [1/16] (narrow) %v26_v0, 40  ;;  %v28_v2 = vld [vmem:[#allocation2 + $0x10] sm:$0xff]  ;;  %v29_v3 = vld [vmem:[#allocation2 + $0x18] sm:$0xff]  ;;  %v30_v4 = vld [vmem:[#allocation2 + $0x20] sm:$0xff]  ;;  %v482_v0 = vmov 0.0   ;;  %s364_s26 = sshll.u32 %s483_s25, 4  ;;  %s365_s26 = int_to_ptr.vmem [resolvable:$true] %s364_s26 }
  0x17   :  { %v31_v5 = vld [vmem:[#allocation2 + $0x28] sm:$0xff]  ;;  %v32_v6 = vld [vmem:[#allocation2 + $0x30] sm:$0xff]  ;;  %v33_v7 = vld [vmem:[#allocation2 + $0x38] sm:$0xff]  ;;  %v511_v17 = vand.u32 127, %v75_v16  ;;  %v540_v40 = vshrl.u32 %v75_v16, 7  ;;  %s453_s28 = scalar_lea.vmem %s365_s26, 128  ;;  %p458_p9 = scmp.lt.s32.totalorder %s365_s26, %s365_s26 }
  0x18   :  { %v34_v8 = vld [vmem:[#allocation2 + $0x40] sm:$0xff]  ;;  %v35_v9 = vld [vmem:[#allocation2 + $0x48] sm:$0xff]  ;;  %v36_v10 = vld [vmem:[#allocation2 + $0x50] sm:$0xff]  ;;  %p454_p8 = scmp.ne.s32.totalorder %s365_s26, %s453_s28  ;;  %p459_p10 = scmp.lt.s32.totalorder %s453_s28, %s453_s28 }
  0x19   :  { %v37_v11 = vld [vmem:[#allocation2 + $0x58] sm:$0xff]  ;;  %v38_v12 = vld [vmem:[#allocation2 + $0x60] sm:$0xff]  ;;  %v39_v13 = vld [vmem:[#allocation2 + $0x68] sm:$0xff]  ;;  %vm80_vm0 = vcmp.lt.s32.totalorder %v511_v17, 8  ;;  %v553_v47 = vadd.s32 8, %v540_v40  ;;  %v566_v54 = vadd.s32 16, %v540_v40 }
  0x1a   :  { %43 = vxpose.xlu0.b32.cont [2/16] (narrow) %v27_v1, 40  ;;  %v40_v14 = vld [vmem:[#allocation2 + $0x70] sm:$0xff]  ;;  %v41_v15 = vld [vmem:[#allocation2 + $0x78] sm:$0xff]  ;;  %v550_v46 = vld [vmem:[%s828_s1] ss:$0 sm:$0xff]  ;;  %v571_v58 = vadd.s32 24, %v540_v40  ;;  %p460_p11 = por %p459_p10, %p458_p9 }
  0x1b   :  { %vm99_vm2 = vcmp.eq.s32.totalorder %v540_v40, %v550_v46  ;;  %vm100_vm3 = vcmp.eq.s32.totalorder %v553_v47, %v550_v46  ;;  %v574_v59 = vadd.s32 32, %v540_v40  ;;  %vm101_vm4 = vcmp.eq.s32.totalorder %v566_v54, %v550_v46 }
  0x1c   :  { %v375_v1 = vsel %vm99_vm2, 1.0, %v482_v0  ;;  %vm102_vm5 = vcmp.eq.s32.totalorder %v571_v58, %v550_v46  ;;  %p461_p12 = pnand %p460_p11, %p454_p8 }
  0x1d   :  { %vm103_vm6 = vcmp.eq.s32.totalorder %v574_v59, %v550_v46 }
  0x1e   :  { %44 = vxpose.xlu0.b32.cont [3/16] (narrow) %v28_v2, 40  ;;  %v376_v2 = vsel %vm100_vm3, 1.0, %v482_v0 }
  0x22   :  { %45 = vxpose.xlu0.b32.cont [4/16] (narrow) %v29_v3, 40 }
  0x26   :  { %46 = vxpose.xlu0.b32.cont [5/16] (narrow) %v30_v4, 40 }
  0x2a   :  { %47 = vxpose.xlu0.b32.cont [6/16] (narrow) %v31_v5, 40 }
  0x2e   :  { %48 = vxpose.xlu0.b32.cont [7/16] (narrow) %v32_v6, 40 }
  0x32   :  { %49 = vxpose.xlu0.b32.cont [8/16] (narrow) %v33_v7, 40 }
  0x36   :  { %50 = vxpose.xlu0.b32.cont [9/16] (narrow) %v34_v8, 40 }
  0x3a   :  { %51 = vxpose.xlu0.b32.cont [10/16] (narrow) %v35_v9, 40 }
  0x3e   :  { %52 = vxpose.xlu0.b32.cont [11/16] (narrow) %v36_v10, 40 }
  0x42   :  { %53 = vxpose.xlu0.b32.cont [12/16] (narrow) %v37_v11, 40 }
  0x46   :  { %54 = vxpose.xlu0.b32.cont [13/16] (narrow) %v38_v12, 40 }
  0x4a   :  { %55 = vxpose.xlu0.b32.cont [14/16] (narrow) %v39_v13, 40  ;;  %v377_v13 = vsel %vm101_vm4, 1.0, %v482_v0 }
  0x4e   :  { %56 = vxpose.xlu0.b32.cont [15/16] (narrow) %v40_v14, 40  ;;  %v621_v14 = vsel %vm102_vm5, 1.0, %v482_v0 }
  0x52   :  { %57 = vxpose.xlu0.b32.end [16/16] (narrow) %v41_v15, 40  ;;  %v627_v15 = vsel %vm103_vm6, 1.0, %v482_v0 }
  0x96   :  { %v58_v18 = vpop.trf.xlu0 }
  0x97   :  { %v516_v19 = vsel %vm80_vm0, %v58_v18, 0.0 }
  0x98   :  { %v184_v20 = vand.u32 2147483647, %v516_v19  ;;  %v204_v56 = vsub.f32 0.0, %v516_v19  ;;  %vm294_vm8 = vcmp.ge.f32.partialorder %v516_v19, 0.0 }
  0x9a   :  { %v189_v21 = vsub.f32 0.0, %v184_v20  ;;  %v59_v22 = vpop.trf.xlu0  ;;  %v593_v3 = vsel %vm99_vm2, %v204_v56, %v516_v19 }
  0x9b   :  { %v521_v23 = vsel %vm80_vm0, %v59_v22, 0.0  ;;  %v214_v16 = vmax.f32 %v593_v3, 0.0 }
  0x9c   :  { %v194_v24 = vmul.f32 1.442695, %v189_v21  ;;  %v185_v25 = vand.u32 2147483647, %v521_v23  ;;  %v205_v57 = vsub.f32 0.0, %v521_v23  ;;  %v156_v10 = vmul.f32 %v376_v2, %v521_v23 }
  0x9d   :  { %v155_v21 = vmul.f32 %v375_v1, %v516_v19  ;;  %vm295_vm7 = vcmp.ge.f32.partialorder %v521_v23, 0.0 }
  0x9e   :  { %389 = vpow2.f32 %v194_v24  ;;  %v190_v26 = vsub.f32 0.0, %v185_v25  ;;  %v60_v27 = vpop.trf.xlu0  ;;  %v599_v4 = vsel %vm100_vm3, %v205_v57, %v521_v23  ;;  %vm717_vm14 = vmxor %vm100_vm3, %vm295_vm7 }
  0x9f   :  { %v526_v28 = vsel %vm80_vm0, %v60_v27, 0.0  ;;  %v215_v20 = vmax.f32 %v599_v4, 0.0  ;;  %vm732_vm3 = vmxor %vm99_vm2, %vm294_vm8 }
  0xa0   :  { %v196_v29 = vmul.f32 1.442695, %v190_v26  ;;  %v186_v30 = vand.u32 2147483647, %v526_v28  ;;  %v206_v6 = vsub.f32 0.0, %v526_v28  ;;  %vm296_vm9 = vcmp.ge.f32.partialorder %v526_v28, 0.0 }
  0xa1   :  { %vm748_vm2 = vmxor %vm101_vm4, %vm296_vm9 }
  0xa2   :  { %391 = vpow2.f32 %v196_v29  ;;  %v191_v31 = vsub.f32 0.0, %v186_v30  ;;  %v61_v32 = vpop.trf.xlu0  ;;  %v638_v24 = vsel %vm101_vm4, %v206_v6, %v526_v28 }
  0xa3   :  { %v531_v33 = vsel %vm80_vm0, %v61_v32, 0.0 }
  0xa4   :  { %v198_v34 = vmul.f32 1.442695, %v191_v31  ;;  %v187_v35 = vand.u32 2147483647, %v531_v33  ;;  %v118_v51 = vmax.f32 %v526_v28, %v531_v33  ;;  %v207_v7 = vsub.f32 0.0, %v531_v33 }
  0xa5   :  { %v652_v31 = vadd.f32 %v156_v10, %v155_v21  ;;  %vm297_vm10 = vcmp.ge.f32.partialorder %v531_v33, 0.0  ;;  %v158_v46 = vmul.f32 %v621_v14, %v531_v33 }
  0xa6   :  { %393 = vpow2.f32 %v198_v34  ;;  %v192_v36 = vsub.f32 0.0, %v187_v35  ;;  %v62_v37 = vpop.trf.xlu0  ;;  %v644_v25 = vsel %vm102_vm5, %v207_v7, %v531_v33  ;;  %vm302_vm4 = vmxor %vm102_vm5, %vm297_vm10 }
  0xa7   :  { %v536_v38 = vsel %vm80_vm0, %v62_v37, 0.0 }
  0xa8   :  { %v538_v39 = vpop.eup %389  ;;  %v200_v41 = vmul.f32 1.442695, %v192_v36  ;;  %v115_v42 = vsel %vm114_vm1, %v536_v38, -inf  ;;  %v188_v43 = vand.u32 2147483647, %v536_v38  ;;  %v208_v29 = vsub.f32 0.0, %v536_v38 }
  0xa9   :  { %v219_v44 = vadd.f32 1.0, %v538_v39  ;;  %v116_v45 = vmax.f32 %v516_v19, %v115_v42  ;;  %v222_v27 = vmul.f32 -0.5, %v538_v39  ;;  %v658_v36 = vmul.f32 %v377_v13, %v526_v28 }
  0xaa   :  { %395 = vpow2.f32 %v200_v41  ;;  %v193_v48 = vsub.f32 0.0, %v188_v43  ;;  %v216_v41 = vmax.f32 %v638_v24, 0.0  ;;  %v217_v42 = vmax.f32 %v644_v25, 0.0 }
  0xab   :  { %v117_v49 = vmax.f32 %v116_v45, %v521_v23  ;;  %397 = vrcp.f32 %v219_v44  ;;  %v225_v43 = vand.u32 2147483647, %v538_v39  ;;  %vm298_vm13 = vcmp.ge.f32.partialorder %v536_v38, 0.0 }
  0xac   :  { %v556_v50 = vpop.eup %391  ;;  %v202_v52 = vmul.f32 1.442695, %v193_v48  ;;  %v223_v48 = vadd.f32 1.0, %v222_v27  ;;  %vm303_vm8 = vmxor %vm103_vm6, %vm298_vm13  ;;  %v159_v59 = vmul.f32 %v627_v15, %v536_v38 }
  0xad   :  { %v228_v53 = vadd.f32 1.0, %v556_v50  ;;  %v119_v55 = vmax.f32 %v117_v49, %v118_v51  ;;  %v671_v51 = vsel %vm103_vm6, %v208_v29, %v536_v38  ;;  %vm693_vm11 = vcmp.lt.f32.partialorder %v225_v43, 0.0004427343 }
  0xae   :  { %399 = vpow2.f32 %v202_v52  ;;  %vm351_vm6 = vcmp.eq.s32.totalorder %v540_v40, 0 }
  0xaf   :  { %401 = vrcp.f32 %v228_v53  ;;  %v120_v61 = vrot.slane %v119_v55, 4 }
  0xb0   :  { %v576_v60 = vpop.eup %393 }
  0xb1   :  { %v237_v62 = vadd.f32 1.0, %v576_v60  ;;  %v121_v63 = vmax.f32 %v119_v55, %v120_v61  ;;  %v240_v45 = vmul.f32 -0.5, %v576_v60  ;;  %v234_v55 = vand.u32 2147483647, %v556_v50 }
  0xb3   :  { %403 = vrcp.f32 %v237_v62  ;;  %v122_v8 = vrot.slane %v121_v63, 2  ;;  %v241_v2 = vadd.f32 1.0, %v240_v45  ;;  %vm702_vm12 = vcmp.lt.f32.partialorder %v234_v55, 0.0004427343 }
  0xb4   :  { %v605_v5 = vpop.eup %395 }
  0xb5   :  { %v610_v9 = vadd.f32 1.0, %v605_v5  ;;  %v398_v11 = vpop.eup %397  ;;  %v123_v12 = vmax.f32 %v121_v63, %v122_v8  ;;  %v689_v8 = vmul.f32 %v538_v39, %v223_v48  ;;  %v709_v48 = vmul.f32 %v576_v60, %v241_v2 }
  0xb6   :  { %v279_v18 = vmul.f32 %v398_v11, %v219_v44 }
  0xb7   :  { %405 = vrcp.f32 %v610_v9  ;;  %v124_v26 = vrot.slane %v123_v12, 1 }
  0xb8   :  { %v632_v22 = vpop.eup %399  ;;  %407 = vlog2.f32 %v219_v44  ;;  %v284_v34 = vsub.f32 2.0, %v279_v18  ;;  %v231_v44 = vmul.f32 -0.5, %v556_v50 }
  0xb9   :  { %v650_v30 = vadd.f32 1.0, %v632_v22  ;;  %v402_v32 = vpop.eup %401  ;;  %v655_v35 = vmax.f32 %v123_v12, %v124_v26  ;;  %409 = vlog2.f32 %v228_v53 }
  0xba   :  { %v280_v37 = vmul.f32 %v402_v32, %v228_v53  ;;  %411 = vlog2.f32 %v237_v62  ;;  %v674_v53 = vmul.f32 %v398_v11, %v284_v34  ;;  %v232_v1 = vadd.f32 1.0, %v231_v44 }
  0xbb   :  { %413 = vrcp.f32 %v650_v30  ;;  %v126_v56 = vsub.f32 %v516_v19, %v655_v35  ;;  %v127_v63 = vsub.f32 %v521_v23, %v655_v35  ;;  %v130_v6 = vsub.f32 %v536_v38, %v655_v35 }
  0xbc   :  { %v285_v49 = vsub.f32 2.0, %v280_v37  ;;  %415 = vlog2.f32 %v610_v9  ;;  %v128_v7 = vsub.f32 %v526_v28, %v655_v35  ;;  %v218_v11 = vmax.f32 %v671_v51, 0.0 }
  0xbd   :  { %v404_v52 = vpop.eup %403  ;;  %417 = vlog2.f32 %v650_v30  ;;  %v129_v21 = vsub.f32 %v531_v33, %v655_v35  ;;  %v131_v26 = vmul.f32 1.442695, %v126_v56  ;;  %v133_v27 = vmul.f32 1.442695, %v127_v63 }
  0xbe   :  { %v290_v57 = vmul.f32 %v402_v32, %v285_v49  ;;  %v281_v61 = vmul.f32 %v404_v52, %v237_v62  ;;  %v243_v62 = vand.u32 2147483647, %v576_v60  ;;  %v304_v29 = vmul.f32 %v538_v39, %v674_v53 }
  0xbf   :  { %v135_v43 = vmul.f32 1.442695, %v128_v7  ;;  %v233_v45 = vmul.f32 %v556_v50, %v232_v1  ;;  %v139_v49 = vmul.f32 1.442695, %v130_v6  ;;  %419 = vpow2.f32 %v131_v26 }
  0xc0   :  { %v286_v10 = vsub.f32 2.0, %v281_v61  ;;  %v305_v18 = vmul.f32 %v556_v50, %v290_v57  ;;  %vm721_vm15 = vcmp.lt.f32.partialorder %v243_v62, 0.0004427343  ;;  %421 = vpow2.f32 %v133_v27 }
  0xc1   :  { %v406_v12 = vpop.eup %405  ;;  %v252_v63 = vand.u32 2147483647, %v605_v5  ;;  %v137_v1 = vmul.f32 1.442695, %v129_v21  ;;  %v309_v19 = vsel %vm732_vm3, %v304_v29, %v674_v53  ;;  %423 = vpow2.f32 %v135_v43 }
  0xc2   :  { %v291_v34 = vmul.f32 %v404_v52, %v286_v10  ;;  %v282_v37 = vmul.f32 %v406_v12, %v610_v9  ;;  %v408_v44 = vpop.eup %407  ;;  %v249_v52 = vmul.f32 -0.5, %v605_v5  ;;  %v310_v47 = vsel %vm717_vm14, %v305_v18, %v290_v57 }
  0xc3   :  { %v410_v56 = vpop.eup %409  ;;  %v221_v6 = vmul.f32 0.6931472, %v408_v44  ;;  %425 = vpow2.f32 %v139_v49  ;;  %v315_v26 = vsub.f32 1.0, %v310_v47  ;;  %v314_v54 = vsub.f32 1.0, %v309_v19 }
  0xc4   :  { %v306_v50 = vmul.f32 %v576_v60, %v291_v34  ;;  %v287_v55 = vsub.f32 2.0, %v282_v37  ;;  %v412_v61 = vpop.eup %411  ;;  %v258_v60 = vmul.f32 -0.5, %v632_v22  ;;  %v230_v10 = vmul.f32 0.6931472, %v410_v56 }
  0xc5   :  { %v414_v2 = vpop.eup %413  ;;  %v250_v28 = vadd.f32 1.0, %v249_v52  ;;  %427 = vpow2.f32 %v137_v1  ;;  %v239_v29 = vmul.f32 0.6931472, %v412_v61  ;;  %v261_v44 = vand.u32 2147483647, %v632_v22 }
  0xc6   :  { %v292_v57 = vmul.f32 %v406_v12, %v287_v55  ;;  %v416_v62 = vpop.eup %415  ;;  %v311_v18 = vsel %vm748_vm2, %v306_v50, %v291_v34  ;;  %v283_v21 = vmul.f32 %v414_v2, %v650_v30  ;;  %v259_v12 = vadd.f32 1.0, %v258_v60 }
  0xc7   :  { %v418_v53 = vpop.eup %417  ;;  %v227_v30 = vsel %vm693_vm11, %v689_v8, %v221_v6  ;;  %v316_v34 = vsub.f32 1.0, %v311_v18  ;;  %v236_v49 = vsel %vm702_vm12, %v233_v45, %v230_v10  ;;  %v248_v56 = vmul.f32 0.6931472, %v416_v62 }
  0xc8   :  { %v307_v27 = vmul.f32 %v605_v5, %v292_v57  ;;  %v288_v37 = vsub.f32 2.0, %v283_v21  ;;  %v257_v39 = vmul.f32 0.6931472, %v418_v53  ;;  %v320_v52 = vmul.f32 %v315_v26, %v315_v26 }
  0xc9   :  { %v251_v58 = vmul.f32 %v605_v5, %v250_v28  ;;  %vm768_vm5 = vcmp.lt.f32.partialorder %v252_v63, 0.0004427343  ;;  %v420_v13 = vpop.eup %419  ;;  %v319_v8 = vmul.f32 %v314_v54, %v314_v54  ;;  %v245_v23 = vsel %vm721_vm15, %v709_v48, %v239_v29 }
  0xca   :  { %v312_v43 = vsel %vm302_vm4, %v307_v27, %v292_v57  ;;  %v293_v50 = vmul.f32 %v414_v2, %v288_v37  ;;  %v260_v32 = vmul.f32 %v632_v22, %v259_v12  ;;  %v422_v47 = vpop.eup %421  ;;  %v264_v60 = vadd.f32 %v227_v30, %v214_v16 }
  0xcb   :  { %v317_v61 = vsub.f32 1.0, %v312_v43  ;;  %v265_v5 = vadd.f32 %v236_v49, %v215_v20  ;;  %v321_v63 = vmul.f32 %v316_v34, %v316_v34  ;;  %vm781_vm7 = vcmp.lt.f32.partialorder %v261_v44, 0.0004427343  ;;  %v424_v20 = vpop.eup %423 }
  0xcc   :  { %v308_v45 = vmul.f32 %v632_v22, %v293_v50  ;;  %v254_v22 = vsel %vm768_vm5, %v251_v58, %v248_v56  ;;  %v263_v3 = vsel %vm781_vm7, %v260_v32, %v257_v39  ;;  %v141_v4 = vadd.f32 %v422_v47, %v420_v13 }
  0xcd   :  { %v325_v48 = vmul.f32 %v320_v52, %v265_v5  ;;  %v266_v9 = vadd.f32 %v245_v23, %v216_v41  ;;  %v322_v6 = vmul.f32 %v317_v61, %v317_v61  ;;  %v426_v19 = vpop.eup %425  ;;  %v324_v7 = vmul.f32 %v319_v8, %v264_v60 }
  0xce   :  { %v313_v16 = vsel %vm303_vm8, %v308_v45, %v293_v50  ;;  %v142_v57 = vadd.f32 %v424_v20, %v141_v4  ;;  %v267_v10 = vadd.f32 %v254_v22, %v217_v42  ;;  %v268_v18 = vadd.f32 %v263_v3, %v218_v11 }
  0xcf   :  { %v318_v2 = vsub.f32 1.0, %v313_v16  ;;  %v428_v62 = vpop.eup %427  ;;  %v326_v41 = vmul.f32 %v321_v63, %v266_v9  ;;  %v161_v53 = vadd.f32 %v652_v31, %v658_v36  ;;  %v144_v26 = vsel %vm114_vm1, %v426_v19, 0.0 }
  0xd0   :  { %v143_v21 = vadd.f32 %v428_v62, %v142_v57  ;;  %v327_v28 = vmul.f32 %v322_v6, %v267_v10  ;;  %v329_v14 = vadd.f32 %v325_v48, %v324_v7  ;;  %v163_v38 = vsel %vm114_vm1, %v159_v59, 0.0 }
  0xd1   :  { %v323_v24 = vmul.f32 %v318_v2, %v318_v2  ;;  %v162_v15 = vadd.f32 %v161_v53, %v158_v46  ;;  %v373_v47 = vsel %vm80_vm0, 1.0, %v482_v0  ;;  %vm352_vm0 = vcmp.eq.s32.totalorder %v540_v40, 1 }
  0xd2   :  { %v145_v27 = vadd.f32 %v144_v26, %v143_v21  ;;  %v330_v25 = vadd.f32 %v329_v14, %v326_v41 }
  0xd3   :  { %v328_v33 = vmul.f32 %v323_v24, %v268_v18  ;;  %v164_v11 = vadd.f32 %v163_v38, %v162_v15 }
  0xd4   :  { %v146_v42 = vrot.slane %v145_v27, 4  ;;  %v331_v54 = vadd.f32 %v330_v25, %v327_v28 }
  0xd5   :  { %v332_v51 = vsel %vm114_vm1, %v328_v33, 0.0  ;;  %v165_v30 = vrot.slane %v164_v11, 4  ;;  %vm173_vm1 = vcmask 1040384  }
  0xd6   :  { %v147_v29 = vadd.f32 %v146_v42, %v145_v27  ;;  %v333_v12 = vadd.f32 %v332_v51, %v331_v54 }
  0xd7   :  { %v166_v43 = vadd.f32 %v165_v30, %v164_v11 }
  0xd8   :  { %v148_v37 = vrot.slane %v147_v29, 2  ;;  %v334_v36 = vrot.slane %v333_v12, 4 }
  0xd9   :  { %v167_v56 = vrot.slane %v166_v43, 2 }
  0xda   :  { %v149_v31 = vadd.f32 %v148_v37, %v147_v29  ;;  %v335_v49 = vadd.f32 %v334_v36, %v333_v12 }
  0xdb   :  { %v168_v50 = vadd.f32 %v167_v56, %v166_v43 }
  0xdc   :  { %v150_v34 = vrot.slane %v149_v31, 1  ;;  %v336_v39 = vrot.slane %v335_v49, 2 }
  0xdd   :  { %v169_v58 = vrot.slane %v168_v50, 1 }
  0xde   :  { %v151_v44 = vadd.f32 %v150_v34, %v149_v31  ;;  %v337_v52 = vadd.f32 %v336_v39, %v335_v49 }
  0xdf   :  { %v170_v23 = vadd.f32 %v169_v58, %v168_v50 }
  0xe0   :  { %429 = vlog2.f32 %v151_v44  ;;  %v338_v13 = vrot.slane %v337_v52, 1 }
  0xe2   :  { %v339_v45 = vadd.f32 %v338_v13, %v337_v52 }
  0xe4   :  { %v340_v63 = vmul.f32 %v373_v47, %v339_v45 }
  0xe6   :  { %v341_v1 = vsel %vm173_vm1, %v340_v63, 0.0 }
  0xea   :  { %v430_v55 = vpop.eup %429 }
  0xeb   :  { %v153_v61 = vmul.f32 0.6931472, %v430_v55 }
  0xed   :  { %v154_v8 = vadd.f32 %v153_v61, %v655_v35 }
  0xef   :  { %v171_v32 = vsub.f32 %v154_v8, %v170_v23 }
  0xf1   :  { %v172_v60 = vmul.f32 %v373_v47, %v171_v32 }
  0xf3   :  { %v174_v5 = vsel %vm173_vm1, %v172_v60, 0.0 }
  0xf4   :  { %175 = vadd.xlane.f32.xlu1 %v174_v5 }
  0xf8   :  { %342 = vadd.xlane.f32.xlu1 %v341_v1 }
 0x181   :  { %v176_v22 = vpop.xlane.xlu1 %175 }
 0x182   :  { %v177_v3 = vrot.slane %v176_v22, 4 }
 0x184   :  { %v178_v16 = vadd.f32 %v177_v3, %v176_v22 }
 0x185   :  { %v343_v4 = vpop.xlane.xlu1 %342 }
 0x186   :  { %v179_v20 = vrot.slane %v178_v16, 2  ;;  %v344_v35 = vrot.slane %v343_v4, 4 }
 0x188   :  { %v345_v48 = vadd.f32 %v344_v35, %v343_v4  ;;  %v180_v9 = vadd.f32 %v179_v20, %v178_v16 }
 0x18a   :  { %v346_v2 = vrot.slane %v345_v48, 2  ;;  %v181_v6 = vrot.slane %v180_v9, 1 }
 0x18c   :  { %v347_v19 = vadd.f32 %v346_v2, %v345_v48  ;;  %v182_v17 = vadd.f32 %v181_v6, %v180_v9 }
 0x18e   :  { %380 = vpush %v182_v17  ;;  %v348_v0 = vrot.slane %v347_v19, 1 }
 0x190   :  { %v349_v7 = vadd.f32 %v348_v0, %v347_v19 }
 0x192   :  { %382 = vpush %v349_v7 }
 0x1bf   :  { %s381_s1 = spop %380 }
 0x1c0   :  { %v355_v46 = vstv %s381_s1 }
 0x1c3   :  { %s383_s27 = spop %382 }
 0x1c4   :  { %v353_v57 = vstv %s383_s27 }
 0x1c5   :  { %v354_v59 = vsel %vm352_vm0, %v353_v57, 0.0 }
 0x1c6   :  { %v356_v62 = vsel %vm351_vm6, %v355_v46, %v354_v59 }
 0x1c7   :  { %357 = vst [vmem:[#allocation5] sm:$0xff] %v356_v62 }
 0x1c8   :  { %464 = shalt.err (!%p461_p12)
}
 0x1c9   :  { %s465_s3 = scalar_lea.hbm %s829_s2, 128 }
 0x1ca   :  { %p466_p13 = scmp.ne.s32.totalorder %s829_s2, %s465_s3  ;;  %p469_p0 = scmp.lt.u32.totalorder %s465_s3, %s829_s2 }
 0x1cc   :  { %p471_p1 = pnand %p469_p0, %p466_p13 }
 0x1ce   :  { %474 = shalt.err (!%p471_p1)
}
 0x1cf   :  { %367 = dma.vmem_to_hbm [thread:$0]  %s365_s26, 128, %s829_s2, [#allocation4]  }
 0x1d0   :  { %477 = dma.done.wait [#allocation4], 128  }
 0x1d1   :  { %478 = vsyncadd [#allocation4], 4294967168 }
 0x1d2   :  { %371 = vsyncpa [#allocation3], 1 }
 0x1d3   :  { %372 = vsyncpa [#allocation4], 1 }

</bundles_post_ra>
